<compile_context>
chip_gen: v7x
topology: tpu7x:2x2x1
jax: 0.10.0
libtpu: 0.0.40
codegen_flags: <defaults>
</compile_context>

<pallas_src>
import functools

import jax
import jax.numpy as jnp
from jax.experimental import pallas as pl
from jax.experimental.pallas import tpu as pltpu


def _param_pool_kernel(w_ref, x_ref, o_ref, m_acc, l_acc, p_acc, *, n_total, tn):
    # w_ref: (C, 1)        1x1-conv weight (input dtype), channels on sublanes
    # x_ref: (Bt, C, tn)   batch tile; channels on sublanes, spatial on lanes
    # o_ref: (Bt, C)       pooled output rows (lane-dense in C)
    # m_acc/l_acc: (Bt,1)  online-softmax running max / denominator (f32)
    # p_acc: (Bt, C)       running un-normalized weighted sum (f32)
    ni = pl.program_id(1)

    @pl.when(ni == 0)
    def _init():
        m_acc[...] = jnp.full_like(m_acc, -jnp.inf)
        l_acc[...] = jnp.zeros_like(l_acc)
        p_acc[...] = jnp.zeros_like(p_acc)

    x = x_ref[...]                                       # (Bt, C, tn) input dtype
    w = w_ref[...]                                       # (C, 1)      input dtype

    ragged = (n_total % tn) != 0                         # static (trace time)
    if ragged:
        col = jax.lax.broadcasted_iota(jnp.int32, (1, 1, tn), 2) + ni * tn
        valid = col < n_total
        x = jnp.where(valid, x, jnp.zeros_like(x))       # squash OOB-read garbage

    # 1x1 conv == per-pixel channel dot: VPU multiply in the input dtype
    # (bf16 stays packed on v6e/v7x), sublane reduce accumulating in f32.
    logits = jnp.sum(x * w, axis=1, keepdims=True, dtype=jnp.float32)  # (Bt,1,tn)
    if ragged:
        logits = jnp.where(valid, logits, -jnp.inf)

    # Online softmax over the flattened spatial (lane) axis, f32 state.
    m_prev = m_acc[...]                                  # (Bt, 1)
    m_new = jnp.maximum(m_prev, jnp.max(logits, axis=-1))
    alpha = jnp.exp(m_prev - m_new)                      # (Bt, 1)
    e = jnp.exp(logits - m_new[:, :, None])              # (Bt, 1, tn) f32
    if ragged:
        e = jnp.where(valid, e, 0.0)
    l_acc[...] = alpha * l_acc[...] + jnp.sum(e, axis=-1)

    # Weighted spatial pooling with un-normalized weights: multiply in the
    # input dtype, lane reduce accumulating in f32.
    contrib = jnp.sum(x * e.astype(x.dtype), axis=-1, dtype=jnp.float32)  # (Bt, C)
    p_acc[...] = alpha * p_acc[...] + contrib
    m_acc[...] = m_new

    @pl.when(ni == pl.num_programs(1) - 1)
    def _finalize():
        scale = 1.0 / l_acc[...]                         # exact: tiny (Bt,1) divide
        o_ref[...] = (p_acc[...] * scale).astype(o_ref.dtype)   # lane-dense store


def _live_vmem_bytes(bt, tn, C, itemsize):
    """Estimated live VMEM: 2 double-buffered input blocks + ~2 f32-sized
    elementwise temporaries (x*w, x*e before their reductions) + f32 accumulator."""
    blk = bt * C * tn
    return 2 * blk * itemsize + 2 * blk * 4 + bt * C * 4


def _vmem_limits():
    """(live-bytes budget for tiling, cap for vmem_limit_bytes), generation-aware."""
    try:
        cap = int(pltpu.get_tpu_info().vmem_capacity_bytes)
    except Exception:
        cap = 64 << 20                                   # conservative fallback
    cap = min(cap, 128 << 20)
    limit_cap = min(cap - (8 << 20), 100 << 20)          # ~56 MiB v7x, 100 MiB v5e/v6e
    budget = limit_cap - (8 << 20)                       # ~48 MiB v7x, 92 MiB v5e/v6e
    return budget, limit_cap


def _pick_tiles(B, C, N, itemsize, vmem_budget, target_bytes=8 << 20):
    """Pick (batch tile Bt, spatial tile tn).  Bt keeps the (Bt, C) output block
    legal (Bt % 8 == 0 or Bt == B), targets ~8 MiB input blocks (HBM-roofline
    sized on all generations), and guarantees >= 2 batch grid steps when B >= 16
    so both v7x TensorCores get work.  tn tiles N (online softmax) only when a
    full-N block would exceed the live-VMEM budget."""
    per_batch_in = C * N * itemsize
    want = max(1, target_bytes // per_batch_in)

    if B <= 8:
        bt = B
    else:
        bt = 8 * max(1, min(want, B) // 8)
        if B >= 16:
            bt = min(bt, 8 * max(1, (B // 2) // 8))
        while bt > 8 and _live_vmem_bytes(bt, N, C, itemsize) > vmem_budget:
            bt -= 8

    tn = N
    if _live_vmem_bytes(bt, N, C, itemsize) > vmem_budget and N > 128:
        # N-tiled online-softmax path. tn is a multiple of 128; the kernel masks
        # a ragged tail so tn does not need to divide N.
        denom = bt * C * (2 * itemsize + 8)
        k = max(1, (vmem_budget - bt * C * 4) // denom // 128)
        tn = int(min(N, 128 * k))
    # TODO(synk): if even (bt_min, C, 128) overflows the budget (extreme C), a
    # channel-tiled two-pass variant would be needed; not implemented.
    return int(bt), int(tn)


def param_pool(x, conv_weight, *, batch_tile=None, spatial_tile=None):
    """x: (B, C, S, S) float32 or bfloat16, conv_weight: (1, C, 1, 1) -> (B, C) in x.dtype.

    Feeding x as bfloat16 halves HBM traffic (the kernel is bandwidth-bound);
    all reductions still accumulate in f32 inside the kernel."""
    B, C, S, S2 = x.shape
    assert S == S2
    N = S * S
    x_flat = x.reshape(B, C, N)
    w_col = conv_weight.reshape(C, 1).astype(x.dtype)
    itemsize = x_flat.dtype.itemsize

    vmem_budget, vmem_limit_cap = _vmem_limits()
    bt, tn = _pick_tiles(B, C, N, itemsize, vmem_budget)
    if batch_tile is not None:
        bt = int(batch_tile)
    if spatial_tile is not None:
        tn = int(spatial_tile)

    nb = pl.cdiv(B, bt)
    nn = pl.cdiv(N, tn)

    live = _live_vmem_bytes(bt, tn, C, itemsize)
    vmem_limit = int(min(vmem_limit_cap, max(32 << 20, live + (8 << 20))))

    kernel = functools.partial(_param_pool_kernel, n_total=N, tn=tn)

    return pl.pallas_call(
        kernel,
        out_shape=jax.ShapeDtypeStruct((B, C), x.dtype),
        grid_spec=pltpu.PrefetchScalarGridSpec(
            num_scalar_prefetch=0,
            grid=(nb, nn),                                        # reduction axis last
            in_specs=[
                pl.BlockSpec((C, 1), lambda b, n: (0, 0)),        # shared 1x1 weight
                pl.BlockSpec((bt, C, tn), lambda b, n: (b, 0, n)),
            ],
            out_specs=pl.BlockSpec((bt, C), lambda b, n: (b, 0)),  # lane-dense rows
            scratch_shapes=[
                pltpu.VMEM((bt, 1), jnp.float32),   # running max m
                pltpu.VMEM((bt, 1), jnp.float32),   # running denominator l
                pltpu.VMEM((bt, C), jnp.float32),   # running weighted sum
            ],
        ),
        compiler_params=pltpu.CompilerParams(
            dimension_semantics=("parallel", "arbitrary"),  # batch shards across v7x TCs
            vmem_limit_bytes=vmem_limit,
        ),
    )(w_col, x_flat)


def param_pool_reference(x, conv_weight):
    """Pure-JAX reference matching the PyTorch forward (f32)."""
    B, C, S, _ = x.shape
    w = jnp.einsum("bcij,oc->boij", x, conv_weight.reshape(1, C))   # (B,1,S,S)
    w = jax.nn.softmax(w.reshape(B, 1, -1), axis=2).reshape(B, 1, S, S)
    return (x * w).sum(axis=3).sum(axis=2)                          # (B, C)


if __name__ == "__main__":
    key = jax.random.PRNGKey(0)
    kx, kw = jax.random.split(key)

    # --- Test 1: module-shaped small case (B=2, C=4, S=16), f32, auto tiling ---
    B, C, S = 2, 4, 16
    x = jax.random.normal(kx, (B, C, S, S), dtype=jnp.float32)
    # Deterministic Conv2d(C, 1, k=1, bias=False) weight (kaiming-uniform-like).
    bound = 1.0 / jnp.sqrt(jnp.float32(C))
    conv_weight = jax.random.uniform(
        kw, (1, C, 1, 1), dtype=jnp.float32, minval=-bound, maxval=bound
    )
    out = jax.block_until_ready(param_pool(x, conv_weight))
    ref = param_pool_reference(x, conv_weight)
    assert out.shape == (B, C)
    assert jnp.allclose(out, ref, atol=1e-5, rtol=1e-5), (out, ref)

    # --- Test 2: multi-block batch + N-tiled online softmax + ragged spatial
    #     tail (N=144, tn=128) at a realistic channel count ---
    B2, C2, S2 = 16, 128, 12
    kx2, kw2 = jax.random.split(jax.random.PRNGKey(1))
    x2 = jax.random.normal(kx2, (B2, C2, S2, S2), dtype=jnp.float32)
    b2 = 1.0 / jnp.sqrt(jnp.float32(C2))
    w2 = jax.random.uniform(kw2, (1, C2, 1, 1), dtype=jnp.float32, minval=-b2, maxval=b2)
    out2 = jax.block_until_ready(param_pool(x2, w2, batch_tile=8, spatial_tile=128))
    ref2 = param_pool_reference(x2, w2)
    assert jnp.allclose(out2, ref2, atol=1e-4, rtol=1e-4)

    # --- Test 3: bf16 input path (bf16 multiplies, f32 accumulation) ---
    out3 = jax.block_until_ready(
        param_pool(x2.astype(jnp.bfloat16), w2, batch_tile=8, spatial_tile=128)
    )
    assert out3.dtype == jnp.bfloat16
    assert jnp.allclose(out3.astype(jnp.float32), ref2, atol=2e-2, rtol=2e-2)

    print("KERNEL_OK")
</pallas_src>

<mosaic_0001>
module attributes {stable_mosaic.version = 11 : i64} {
  func.func @_param_pool_kernel(%arg0: i32, %arg1: i32, %arg2: memref<4x1xf32, #tpu.memory_space<vmem>>, %arg3: memref<2x4x256xf32, #tpu.memory_space<vmem>>, %arg4: memref<2x4xf32, #tpu.memory_space<vmem>>, %arg5: memref<2x1xf32, #tpu.memory_space<vmem>>, %arg6: memref<2x1xf32, #tpu.memory_space<vmem>>, %arg7: memref<2x4xf32, #tpu.memory_space<vmem>>) attributes {dimension_semantics = [#tpu.dimension_semantics<parallel>, #tpu.dimension_semantics<arbitrary>], iteration_bounds = array<i64: 1, 1>, scalar_prefetch = 0 : i64, scratch_operands = 3 : i64, tpu.core_type = #tpu.core_type<tc>, window_params = [{pipeline_mode = #tpu.pipeline_mode<synchronous>, transform_indices = @transform_0, window_bounds = array<i64: 4, 1>}, {transform_indices = @transform_1, window_bounds = array<i64: 2, 4, 256>}, {transform_indices = @transform_2, window_bounds = array<i64: 2, 4>}]} {
    %c0_i32 = arith.constant 0 : i32
    %0 = arith.cmpi eq, %arg1, %c0_i32 : i32
    %1 = arith.extui %0 : i1 to i32
    %c0_i32_0 = arith.constant 0 : i32
    %2 = arith.cmpi ne, %1, %c0_i32_0 : i32
    scf.if %2 {
      %cst_22 = arith.constant 0xFF800000 : f32
      %36 = vector.broadcast %cst_22 : f32 to vector<2x1xf32>
      %c0_23 = arith.constant 0 : index
      %c0_24 = arith.constant 0 : index
      %37 = vector.load %arg5[%c0_23, %c0_24] : memref<2x1xf32, #tpu.memory_space<vmem>>, vector<2x1xf32>
      tpu.vector_store %arg5[%c0_23, %c0_24], %36 {strides = array<i32>} : memref<2x1xf32, #tpu.memory_space<vmem>>, vector<2x1xf32>,
      %cst_25 = arith.constant 0.000000e+00 : f32
      %38 = vector.broadcast %cst_25 : f32 to vector<2x1xf32>
      %c0_26 = arith.constant 0 : index
      %c0_27 = arith.constant 0 : index
      %39 = vector.load %arg6[%c0_26, %c0_27] : memref<2x1xf32, #tpu.memory_space<vmem>>, vector<2x1xf32>
      tpu.vector_store %arg6[%c0_26, %c0_27], %38 {strides = array<i32>} : memref<2x1xf32, #tpu.memory_space<vmem>>, vector<2x1xf32>,
      %cst_28 = arith.constant 0.000000e+00 : f32
      %40 = vector.broadcast %cst_28 : f32 to vector<2x4xf32>
      %c0_29 = arith.constant 0 : index
      %c0_30 = arith.constant 0 : index
      %41 = vector.load %arg7[%c0_29, %c0_30] : memref<2x4xf32, #tpu.memory_space<vmem>>, vector<2x4xf32>
      tpu.vector_store %arg7[%c0_29, %c0_30], %40 {strides = array<i32>} : memref<2x4xf32, #tpu.memory_space<vmem>>, vector<2x4xf32>,
    } else {
    }
    %c0 = arith.constant 0 : index
    %c0_1 = arith.constant 0 : index
    %c0_2 = arith.constant 0 : index
    %3 = vector.load %arg3[%c0, %c0_1, %c0_2] : memref<2x4x256xf32, #tpu.memory_space<vmem>>, vector<2x4x256xf32>
    %c0_3 = arith.constant 0 : index
    %c0_4 = arith.constant 0 : index
    %4 = vector.load %arg2[%c0_3, %c0_4] : memref<4x1xf32, #tpu.memory_space<vmem>>, vector<4x1xf32>
    %5 = vector.shape_cast %4 : vector<4x1xf32> to vector<1x4x1xf32>
    %6 = vector.broadcast %5 : vector<1x4x1xf32> to vector<2x4x256xf32>
    %7 = arith.mulf %3, %6 : vector<2x4x256xf32>
    %cst = arith.constant dense<0.000000e+00> : vector<2x256xf32>
    %8 = vector.multi_reduction <add>, %7, %cst [1] : vector<2x4x256xf32> to vector<2x256xf32>
    %9 = vector.shape_cast %8 : vector<2x256xf32> to vector<2x1x256xf32>
    %c0_5 = arith.constant 0 : index
    %c0_6 = arith.constant 0 : index
    %10 = vector.load %arg5[%c0_5, %c0_6] : memref<2x1xf32, #tpu.memory_space<vmem>>, vector<2x1xf32>
    %cst_7 = arith.constant dense<0xFF800000> : vector<2x1xf32>
    %11 = vector.multi_reduction <maximumf>, %9, %cst_7 [2] : vector<2x1x256xf32> to vector<2x1xf32>
    %12 = arith.maximumf %10, %11 : vector<2x1xf32>
    %13 = arith.subf %10, %12 : vector<2x1xf32>
    %14 = math.exp %13 : vector<2x1xf32>
    %15 = vector.shape_cast %12 : vector<2x1xf32> to vector<2x1x1xf32>
    %16 = vector.broadcast %15 : vector<2x1x1xf32> to vector<2x1x256xf32>
    %17 = arith.subf %9, %16 : vector<2x1x256xf32>
    %18 = math.exp %17 : vector<2x1x256xf32>
    %c0_8 = arith.constant 0 : index
    %c0_9 = arith.constant 0 : index
    %19 = vector.load %arg6[%c0_8, %c0_9] : memref<2x1xf32, #tpu.memory_space<vmem>>, vector<2x1xf32>
    %20 = arith.mulf %14, %19 : vector<2x1xf32>
    %cst_10 = arith.constant dense<0.000000e+00> : vector<2x1xf32>
    %21 = vector.multi_reduction <add>, %18, %cst_10 [2] : vector<2x1x256xf32> to vector<2x1xf32>
    %22 = arith.addf %20, %21 : vector<2x1xf32>
    %c0_11 = arith.constant 0 : index
    %c0_12 = arith.constant 0 : index
    %23 = vector.load %arg6[%c0_11, %c0_12] : memref<2x1xf32, #tpu.memory_space<vmem>>, vector<2x1xf32>
    tpu.vector_store %arg6[%c0_11, %c0_12], %22 {strides = array<i32>} : memref<2x1xf32, #tpu.memory_space<vmem>>, vector<2x1xf32>,
    %24 = vector.broadcast %18 : vector<2x1x256xf32> to vector<2x4x256xf32>
    %25 = arith.mulf %3, %24 : vector<2x4x256xf32>
    %cst_13 = arith.constant dense<0.000000e+00> : vector<2x4xf32>
    %26 = vector.multi_reduction <add>, %25, %cst_13 [2] : vector<2x4x256xf32> to vector<2x4xf32>
    %c0_14 = arith.constant 0 : index
    %c0_15 = arith.constant 0 : index
    %27 = vector.load %arg7[%c0_14, %c0_15] : memref<2x4xf32, #tpu.memory_space<vmem>>, vector<2x4xf32>
    %28 = vector.broadcast %14 : vector<2x1xf32> to vector<2x4xf32>
    %29 = arith.mulf %28, %27 : vector<2x4xf32>
    %30 = arith.addf %29, %26 : vector<2x4xf32>
    %c0_16 = arith.constant 0 : index
    %c0_17 = arith.constant 0 : index
    %31 = vector.load %arg7[%c0_16, %c0_17] : memref<2x4xf32, #tpu.memory_space<vmem>>, vector<2x4xf32>
    tpu.vector_store %arg7[%c0_16, %c0_17], %30 {strides = array<i32>} : memref<2x4xf32, #tpu.memory_space<vmem>>, vector<2x4xf32>,
    %c0_18 = arith.constant 0 : index
    %c0_19 = arith.constant 0 : index
    %32 = vector.load %arg5[%c0_18, %c0_19] : memref<2x1xf32, #tpu.memory_space<vmem>>, vector<2x1xf32>
    tpu.vector_store %arg5[%c0_18, %c0_19], %12 {strides = array<i32>} : memref<2x1xf32, #tpu.memory_space<vmem>>, vector<2x1xf32>,
    %c0_i32_20 = arith.constant 0 : i32
    %33 = arith.cmpi eq, %arg1, %c0_i32_20 : i32
    %34 = arith.extui %33 : i1 to i32
    %c0_i32_21 = arith.constant 0 : i32
    %35 = arith.cmpi ne, %34, %c0_i32_21 : i32
    scf.if %35 {
      %c0_22 = arith.constant 0 : index
      %c0_23 = arith.constant 0 : index
      %36 = vector.load %arg6[%c0_22, %c0_23] : memref<2x1xf32, #tpu.memory_space<vmem>>, vector<2x1xf32>
      %cst_24 = arith.constant 1.000000e+00 : f32
      %37 = vector.broadcast %cst_24 : f32 to vector<2x1xf32>
      %38 = arith.divf %37, %36 : vector<2x1xf32>
      %c0_25 = arith.constant 0 : index
      %c0_26 = arith.constant 0 : index
      %39 = vector.load %arg7[%c0_25, %c0_26] : memref<2x4xf32, #tpu.memory_space<vmem>>, vector<2x4xf32>
      %40 = vector.broadcast %38 : vector<2x1xf32> to vector<2x4xf32>
      %41 = arith.mulf %39, %40 : vector<2x4xf32>
      %c0_27 = arith.constant 0 : index
      %c0_28 = arith.constant 0 : index
      %42 = vector.load %arg4[%c0_27, %c0_28] : memref<2x4xf32, #tpu.memory_space<vmem>>, vector<2x4xf32>
      tpu.vector_store %arg4[%c0_27, %c0_28], %41 {strides = array<i32>} : memref<2x4xf32, #tpu.memory_space<vmem>>, vector<2x4xf32>,
    } else {
    }
    return
  }
  func.func @transform_0(%arg0: i32, %arg1: i32) -> (i32, i32) {
    %c0_i32 = arith.constant 0 : i32
    %c0_i32_0 = arith.constant 0 : i32
    %c0_i32_1 = arith.constant 0 : i32
    return %c0_i32, %c0_i32_0 : i32, i32
  }
  func.func @transform_1(%arg0: i32, %arg1: i32) -> (i32, i32, i32) {
    %c0_i32 = arith.constant 0 : i32
    %c0_i32_0 = arith.constant 0 : i32
    return %arg0, %c0_i32, %arg1 : i32, i32, i32
  }
  func.func @transform_2(%arg0: i32, %arg1: i32) -> (i32, i32) {
    %c0_i32 = arith.constant 0 : i32
    %c0_i32_0 = arith.constant 0 : i32
    return %arg0, %c0_i32 : i32, i32
  }
}

</mosaic_0001>

<bundles_post_ra>
// kernel: tpu_custom_call.1
= control target key start
LH: loop header
LB: loop body
LE: loop exit
PB: predicated region body
PF: predicated region fallthrough
CT: control target
= control target key end

     0   :  { %7 = vsyncpa [#allocation6], 0  ;;  %s405_s0 = inlined_call_operand.vmem [shape: f32[4,1], index: 0, kind: input, shape index: {}]   ;;  %s406_s1 = inlined_call_operand.hbm [shape: f32[2,4,256], index: 1, kind: input, shape index: {}]   ;;  %s407_s2 = inlined_call_operand.hbm [shape: f32[2,4], index: 2, kind: output, shape index: {}]  }
   0x1   :  { %8 = vsyncpa [#allocation7], 0  ;;  %s320_s9 = smov [#allocation5]   ;;  %s272_s13 = scalar_lea.hbm %s406_s1, 256 }
   0x2   :  { %s16_s10 = sshll.u32 %s320_s9, 4  ;;  %p273_p0 = scmp.ne.s32.totalorder %s406_s1, %s272_s13  ;;  %s17_s10 = int_to_ptr.vmem [resolvable:$true] %s16_s10 }
   0x3   :  { %p276_p1 = scmp.lt.u32.totalorder %s272_s13, %s406_s1 }
   0x5   :  { %p278_p2 = pnand %p276_p1, %p273_p0 }
   0x7   :  { %281 = shalt.err (!%p278_p2)
}
   0x8   :  { %s282_s18 = scalar_lea.vmem %s17_s10, 256  ;;  %p287_p4 = scmp.lt.s32.totalorder %s17_s10, %s17_s10 }
   0x9   :  { %p283_p3 = scmp.ne.s32.totalorder %s17_s10, %s282_s18  ;;  %p288_p5 = scmp.lt.s32.totalorder %s282_s18, %s282_s18 }
   0xb   :  { %p289_p6 = por %p288_p5, %p287_p4 }
   0xd   :  { %p290_p7 = pnand %p289_p6, %p283_p3 }
   0xf   :  { %293 = shalt.err (!%p290_p7)
}
  0x10   :  { %s321_s19 = smov 128   ;;  %s322_s20 = smov 8  }
  0x11   :  { %22 = dma.hbm_to_vmem [thread:$0]  %s406_s1, 256, %s17_s10, [#allocation6], %s321_s19, %s321_s19, %s322_s20  }
  0x12   :  { %316 = dma.done.wait [#allocation6], 256  }
  0x13   :  { %317 = vsyncadd [#allocation6], 4294967040  ;;  %v323_v0 = vmov 0   ;;  %v37_v1 = vld [vmem:[%s405_s0] sm:$0xf]  ;;  %v45_v4 = vlaneseq  ;;  %v363_v9 = vld [vmem:[#allocation5] sm:$0xff] }
  0x14   :  { %258 = vset.pattern.permute.xlu0 %v323_v0  ;;  %259 = vset.pattern.permute.xlu1 %v323_v0  ;;  %v324_v2 = vmov 839922192   ;;  %v365_v10 = vld [vmem:[#allocation5 + $0x8] sm:$0xff]  ;;  %vm58_vm0 = vcmask 1043456   ;;  %vm30_vm1 = vcmask 1024   ;;  %v325_v46 = vmov -inf  }
  0x15   :  { %40 = vperm.xlu0 %258, %v37_v1   ;;  %v43_v3 = vunpack.c.l.s4 %v324_v2  ;;  %v360_v6 = vshrl.u32 %v45_v4, 7  ;;  %31 = vst.msk [vmem:[#allocation2] sm:$0x3] %vm30_vm1, %v325_v46  ;;  %v326_v47 = vmov 0.0   ;;  %v327_v48 = vmov 1966171168  }
  0x16   :  { %32 = vst.msk [vmem:[#allocation3] sm:$0x3] %vm30_vm1, %v326_v47  ;;  %v105_v49 = vunpack.c.l.s4 %v327_v48  ;;  %vm96_vm2 = vcmask 1041409   ;;  %vm33_vm3 = vcmask 25600   ;;  %s328_s0 = smov [#allocation8]  }
  0x17   :  { %v44_v5 = vunpack.c.0.s8 %v43_v3  ;;  %v132_v62 = vsub.s32 0, %v360_v6  ;;  %34 = vst.msk [vmem:[#allocation4] sm:$0x3] %vm33_vm3, %v326_v47  ;;  %s240_s1 = sshll.u32 %s328_s0, 4  ;;  %s241_s1 = int_to_ptr.vmem [resolvable:$true] %s240_s1 }
  0x18   :  { %v106_v50 = vunpack.c.0.s8 %v105_v49  ;;  %s294_s25 = scalar_lea.vmem %s241_s1, 32  ;;  %p299_p9 = scmp.lt.s32.totalorder %s241_s1, %s241_s1 }
  0x19   :  { %v47_v7 = vsub.s32 %v44_v5, %v360_v6  ;;  %p295_p8 = scmp.ne.s32.totalorder %s241_s1, %s294_s25  ;;  %p300_p10 = scmp.lt.s32.totalorder %s294_s25, %s294_s25 }
  0x1a   :  { %v109_v54 = vsub.s32 %v106_v50, %v360_v6 }
  0x1b   :  { %p301_p11 = por %p300_p10, %p299_p9 }
  0x1c   :  { %v87_v51 = vld [vmem:[#allocation2] sm:$0x3] }
  0x1d   :  { %p302_p12 = pnand %p301_p11, %p295_p8 }
  0x94   :  { %v41_v8 = vpop.permute.xlu0 %40 }
  0x95   :  { %v48_v11 = vrot.slane %v41_v8, %v47_v7 }
  0x97   :  { %v50_v12 = vmul.f32 %v48_v11, %v363_v9  ;;  %v51_v13 = vmul.f32 %v48_v11, %v365_v10 }
  0x99   :  { %v54_v14 = vcombine.high %v50_v12, %v50_v12  ;;  %v55_v15 = vcombine.high %v51_v13, %v51_v13  ;;  %v59_v16 = vsel %vm58_vm0, %v50_v12, 0.0  ;;  %v73_v17 = vsel %vm58_vm0, %v51_v13, 0.0 }
  0x9a   :  { %v60_v18 = vrot.slane %v59_v16, 4  ;;  %v74_v19 = vrot.slane %v73_v17, 4 }
  0x9b   :  { %v66_v20 = vsel %vm58_vm0, %v54_v14, 0.0  ;;  %v80_v21 = vsel %vm58_vm0, %v55_v15, 0.0 }
  0x9c   :  { %v61_v22 = vadd.f32 %v60_v18, %v59_v16  ;;  %v67_v23 = vrot.slane %v66_v20, 4  ;;  %v75_v24 = vadd.f32 %v74_v19, %v73_v17  ;;  %v81_v25 = vrot.slane %v80_v21, 4 }
  0x9e   :  { %v76_v26 = vrot.slane %v75_v24, 2  ;;  %v82_v27 = vadd.f32 %v81_v25, %v80_v21  ;;  %v62_v28 = vrot.slane %v61_v22, 2  ;;  %v68_v29 = vadd.f32 %v67_v23, %v66_v20 }
  0xa0   :  { %v77_v30 = vadd.f32 %v76_v26, %v75_v24  ;;  %v83_v31 = vrot.slane %v82_v27, 2  ;;  %v63_v32 = vadd.f32 %v62_v28, %v61_v22  ;;  %v69_v33 = vrot.slane %v68_v29, 2 }
  0xa2   :  { %v78_v34 = vrot.slane %v77_v30, 1  ;;  %v84_v35 = vadd.f32 %v83_v31, %v82_v27  ;;  %v64_v36 = vrot.slane %v63_v32, 1  ;;  %v70_v37 = vadd.f32 %v69_v33, %v68_v29 }
  0xa4   :  { %v85_v38 = vrot.slane %v84_v35, 1  ;;  %v71_v39 = vrot.slane %v70_v37, 1  ;;  %v79_v40 = vadd.f32 %v78_v34, %v77_v30  ;;  %v65_v42 = vadd.f32 %v64_v36, %v63_v32  ;;  %v154_v34 = vld [vmem:[#allocation3] sm:$0x3] }
  0xa6   :  { %v86_v41 = vadd.f32 %v85_v38, %v84_v35  ;;  %v72_v43 = vadd.f32 %v71_v39, %v70_v37 }
  0xa8   :  { %v91_v44 = vmax.f32 %v79_v40, %v86_v41  ;;  %v88_v45 = vmax.f32 %v65_v42, %v72_v43 }
  0xaa   :  { %92 = vmax.xlane.f32.xlu1 %v91_v44  ;;  %89 = vmax.xlane.f32.xlu0 %v88_v45  ;;  %v195_v45 = vld [vmem:[#allocation4] sm:$0x3] }
 0x137   :  { %v93_v52 = vpop.xlane.xlu1 %92  ;;  %v90_v53 = vpop.xlane.xlu0 %89 }
 0x138   :  { %v97_v55 = vsel %vm96_vm2, %v93_v52, %v90_v53 }
 0x139   :  { %v99_v56 = vmax.f32 %v87_v51, %v97_v55 }
 0x13b   :  { %v100_v57 = vsub.f32 %v87_v51, %v99_v56  ;;  %219 = vst.msk [vmem:[#allocation2] sm:$0x3] %vm30_vm1, %v99_v56  ;;  %v110_v58 = vrot.slane %v99_v56, %v109_v54 }
 0x13d   :  { %v118_v59 = vrot.slane %v110_v58, %v109_v54  ;;  %v111_v60 = vcombine.high %v110_v58, %v110_v58 }
 0x13f   :  { %127 = vperm.xlu1 %259, %v118_v59   ;;  %v125_v61 = vrot.slane %v111_v60, %v109_v54 }
 0x143   :  { %135 = vperm.xlu1 %259, %v125_v61  }
 0x1be   :  { %v128_v63 = vpop.permute.xlu1 %127 }
 0x1bf   :  { %v133_v0 = vrot.slane %v128_v63, %v132_v62 }
 0x1c1   :  { %v142_v1 = vsub.f32 %v65_v42, %v133_v0  ;;  %v143_v2 = vsub.f32 %v72_v43, %v133_v0 }
 0x1c2   :  { %v136_v3 = vpop.permute.xlu1 %135 }
 0x1c3   :  { %v146_v5 = vmul.f32 1.442695, %v142_v1  ;;  %v148_v7 = vmul.f32 1.442695, %v143_v2  ;;  %v141_v8 = vrot.slane %v136_v3, %v132_v62 }
 0x1c5   :  { %260 = vpow2.f32 %v146_v5  ;;  %v144_v11 = vsub.f32 %v79_v40, %v141_v8  ;;  %v145_v12 = vsub.f32 %v86_v41, %v141_v8  ;;  %v205_v40 = vand.u32 127, %v45_v4 }
 0x1c6   :  { %262 = vpow2.f32 %v148_v7 }
 0x1c7   :  { %v150_v13 = vmul.f32 1.442695, %v144_v11  ;;  %v152_v14 = vmul.f32 1.442695, %v145_v12  ;;  %v208_v43 = vsub.s32 %v205_v40, %v360_v6 }
 0x1c9   :  { %264 = vpow2.f32 %v150_v13 }
 0x1ca   :  { %266 = vpow2.f32 %v152_v14 }
 0x1cf   :  { %v261_v15 = vpop.eup %260 }
 0x1d0   :  { %v263_v16 = vpop.eup %262 }
 0x1d1   :  { %v156_v17 = vadd.f32 %v263_v16, %v261_v15  ;;  %v173_v18 = vcombine.low %v261_v15, %v263_v16 }
 0x1d3   :  { %v265_v19 = vpop.eup %264  ;;  %157 = vadd.xlane.f32.xlu1 %v156_v17  ;;  %v177_v20 = vmul.f32 %v173_v18, %v363_v9  ;;  %v101_v9 = vmul.f32 1.442695, %v100_v57 }
 0x1d4   :  { %v267_v21 = vpop.eup %266 }
 0x1d5   :  { %v159_v22 = vadd.f32 %v267_v21, %v265_v19  ;;  %v181_v23 = vcombine.high %v177_v20, %v177_v20  ;;  %v174_v24 = vcombine.low %v265_v19, %v267_v21  ;;  %v185_v25 = vsel %vm58_vm0, %v177_v20, 0.0 }
 0x1d6   :  { %268 = vpow2.f32 %v101_v9 }
 0x1d7   :  { %160 = vadd.xlane.f32.xlu0 %v159_v22  ;;  %v186_v26 = vsel %vm58_vm0, %v181_v23, 0.0  ;;  %v178_v27 = vmul.f32 %v174_v24, %v365_v10 }
 0x1d8   :  { %v187_v28 = vadd.f32 %v186_v26, %v185_v25 }
 0x1d9   :  { %v182_v29 = vcombine.high %v178_v27, %v178_v27  ;;  %v190_v30 = vsel %vm58_vm0, %v178_v27, 0.0 }
 0x1db   :  { %188 = vadd.xlane.f32.xlu0 %v187_v28  ;;  %v191_v31 = vsel %vm58_vm0, %v182_v29, 0.0 }
 0x1dc   :  { %v192_v32 = vadd.f32 %v191_v31, %v190_v30 }
 0x1df   :  { %193 = vadd.xlane.f32.xlu0 %v192_v32 }
 0x1e0   :  { %v269_v33 = vpop.eup %268 }
 0x1e1   :  { %v155_v10 = vmul.f32 %v269_v33, %v154_v34 }
 0x1f5   :  { %198 = vperm.xlu0 %258, %v269_v33  }
 0x260   :  { %v158_v35 = vpop.xlane.xlu1 %157 }
 0x264   :  { %v161_v36 = vpop.xlane.xlu0 %160 }
 0x265   :  { %v164_v37 = vsel %vm96_vm2, %v161_v36, %v158_v35 }
 0x266   :  { %v166_v38 = vadd.f32 %v164_v37, %v155_v10 }
 0x268   :  { %168 = vst.msk [vmem:[#allocation3] sm:$0x3] %vm30_vm1, %v166_v38  ;;  %v189_v39 = vpop.xlane.xlu0 %188 }
 0x269   :  { %v209_v46 = vrot.slane %v189_v39, %v208_v43 }
 0x26c   :  { %v194_v41 = vpop.xlane.xlu0 %193 }
 0x26d   :  { %v213_v44 = vrot.slane %v194_v41, %v208_v43 }
 0x26f   :  { %v223_v42 = vld [vmem:[#allocation3] sm:$0x3]  ;;  %v214_v49 = vsel %vm96_vm2, %v213_v44, %v209_v46 }
 0x270   :  { %270 = vrcp.f32 %v223_v42 }
 0x274   :  { %v199_v47 = vpop.permute.xlu0 %198 }
 0x275   :  { %v201_v48 = vmul.f32 %v199_v47, %v195_v45 }
 0x277   :  { %v216_v50 = vadd.f32 %v214_v49, %v201_v48 }
 0x279   :  { %218 = vst.msk [vmem:[#allocation4] sm:$0x3] %vm33_vm3, %v216_v50 }
 0x27a   :  { %v271_v51 = vpop.eup %270 }
 0x27b   :  { %229 = vperm.xlu1 %259, %v271_v51  }
 0x280   :  { %v226_v4 = vld [vmem:[#allocation4] sm:$0x3] }
 0x2fa   :  { %v230_v52 = vpop.permute.xlu1 %229 }
 0x2fb   :  { %v232_v53 = vmul.f32 %v230_v52, %v226_v4 }
 0x2fd   :  { %233 = vst.msk [vmem:[#allocation8] sm:$0x3] %vm33_vm3, %v232_v53 }
 0x2fe   :  { %305 = shalt.err (!%p302_p12)
}
 0x2ff   :  { %s306_s28 = scalar_lea.hbm %s407_s2, 32 }
 0x300   :  { %p307_p13 = scmp.ne.s32.totalorder %s407_s2, %s306_s28  ;;  %p310_p0 = scmp.lt.u32.totalorder %s306_s28, %s407_s2 }
 0x302   :  { %p312_p1 = pnand %p310_p0, %p307_p13 }
 0x304   :  { %315 = shalt.err (!%p312_p1)
}
 0x305   :  { %243 = dma.vmem_to_hbm [thread:$0]  %s241_s1, 32, %s407_s2, [#allocation7]  }
 0x306   :  { %318 = dma.done.wait [#allocation7], 32  }
 0x307   :  { %319 = vsyncadd [#allocation7], 4294967264 }
 0x308   :  { %247 = vsyncpa [#allocation6], 1 }
 0x309   :  { %248 = vsyncpa [#allocation7], 1 }

</bundles_post_ra>
